<compile_context>
chip_gen: v5e
topology: v5e:2x2
jax: 0.10.0
libtpu: 0.0.40
codegen_flags: <defaults>
</compile_context>

<pallas_src>
import functools

import numpy as np
import jax
import jax.numpy as jnp
from jax.experimental import pallas as pl
from jax.experimental.pallas import tpu as pltpu


# ----------------------------------------------------------------------------
# Host-side construction of the pooling matrix (reproduces torch adaptive pool).
# ----------------------------------------------------------------------------
def _adaptive_pool_1d_matrix(in_size: int, out_size: int) -> np.ndarray:
    """A[o, i] = 1/len(region_o) if i in region_o else 0 (PyTorch adaptive pool)."""
    A = np.zeros((out_size, in_size), dtype=np.float32)
    for o in range(out_size):
        start = (o * in_size) // out_size
        end = -((-(o + 1) * in_size) // out_size)  # ceil((o+1)*in/out)
        A[o, start:end] = 1.0 / (end - start)
    return A


@functools.lru_cache(maxsize=None)
def build_psp_matrix(H: int, W: int, sizes: tuple, k_pad: int) -> np.ndarray:
    """(H*W, k_pad) f32 matrix s.t. x_flat @ M[:, :K] == concat of pooled outputs."""
    blocks = []
    for s in sizes:
        Ah = _adaptive_pool_1d_matrix(H, s)            # (s, H)
        Aw = _adaptive_pool_1d_matrix(W, s)            # (s, W)
        Ws = np.einsum("oh,pw->ophw", Ah, Aw).reshape(s * s, H * W)
        blocks.append(Ws)
    M = np.concatenate(blocks, axis=0)                 # (K, H*W)
    K = M.shape[0]
    M_t = np.ascontiguousarray(M.T).astype(np.float32)  # (H*W, K)
    if k_pad > K:
        M_t = np.pad(M_t, ((0, 0), (0, k_pad - K)))    # zero lanes -> zero output cols
    return M_t


def _round_up(x: int, m: int) -> int:
    return ((x + m - 1) // m) * m


def _choose_row_tile(rows: int, hw: int, itemsize: int) -> int:
    """Largest row tile whose double-buffered x input stays well inside VMEM."""
    per_buffer_budget = 12 * 1024 * 1024          # ~24 MiB double-buffered on v7x-safe
    tm = per_buffer_budget // max(1, hw * itemsize)
    tm = max(8, min(1024, (tm // 8) * 8))         # multiple of 8 sublanes, capped
    return min(tm, _round_up(rows, 8))


# ----------------------------------------------------------------------------
# Pallas kernel: per-row-tile MXU matmul  (TM, H*W) @ (H*W, K_pad) -> (TM, K_pad)
# ----------------------------------------------------------------------------
def _psp_matmul_kernel(x_ref, m_ref, o_ref):
    o_ref[...] = jnp.dot(
        x_ref[...], m_ref[...], preferred_element_type=jnp.float32
    ).astype(o_ref.dtype)


def my_psp_module(feats: jax.Array, sizes=(1, 3, 6, 8)) -> jax.Array:
    """JAX/Pallas equivalent of MY_PSPModule.forward. feats: (N, C, H, W) -> (N, C, K)."""
    N, C, H, W = feats.shape
    HW = H * W
    K = sum(s * s for s in sizes)
    K_pad = _round_up(K, 128)                      # lane-dense output stores

    # Pooling matrix stays f32 regardless of feats dtype (exact 1/region weights).
    M = jnp.asarray(build_psp_matrix(H, W, tuple(sizes), K_pad))   # (HW, K_pad) f32

    rows = N * C
    itemsize = jnp.dtype(feats.dtype).itemsize
    TM = _choose_row_tile(rows, HW, itemsize)
    rows_pad = _round_up(rows, TM)

    x_flat = feats.reshape(rows, HW)
    if rows_pad != rows:
        x_flat = jnp.pad(x_flat, ((0, rows_pad - rows), (0, 0)))

    grid = (rows_pad // TM,)

    cost = pl.CostEstimate(
        flops=2 * rows_pad * HW * K_pad,
        transcendentals=0,
        bytes_accessed=rows_pad * HW * itemsize
        + rows_pad * K_pad * itemsize
        + HW * K_pad * 4,
    )

    out_flat = pl.pallas_call(
        _psp_matmul_kernel,
        out_shape=jax.ShapeDtypeStruct((rows_pad, K_pad), feats.dtype),
        grid_spec=pltpu.PrefetchScalarGridSpec(
            num_scalar_prefetch=0,
            grid=grid,
            in_specs=[
                # row tiles stream through, double-buffered by the pipeline
                pl.BlockSpec((TM, HW), lambda i: (i, 0)),
                # pooling matrix: same block every step -> DMA'd once, resident
                pl.BlockSpec((HW, K_pad), lambda i: (0, 0)),
            ],
            out_specs=pl.BlockSpec((TM, K_pad), lambda i: (i, 0)),
        ),
        compiler_params=pltpu.CompilerParams(
            dimension_semantics=("parallel",),      # megacore sharding on v7x
            vmem_limit_bytes=64 << 20,
        ),
        cost_estimate=cost,
    )(x_flat, M)

    return out_flat[:rows, :K].reshape(N, C, K)


# ----------------------------------------------------------------------------
# Pure-JAX reference (mirrors the torch module exactly) for a sanity check.
# ----------------------------------------------------------------------------
def my_psp_module_ref(feats: jax.Array, sizes=(1, 3, 6, 8)) -> jax.Array:
    N, C, H, W = feats.shape
    priors = []
    for s in sizes:
        Ah = jnp.asarray(_adaptive_pool_1d_matrix(H, s))
        Aw = jnp.asarray(_adaptive_pool_1d_matrix(W, s))
        pooled = jnp.einsum("oh,nchw,pw->ncop", Ah, feats.astype(jnp.float32), Aw)
        priors.append(pooled.reshape(N, C, -1))
    return jnp.concatenate(priors, axis=-1).astype(feats.dtype)


if __name__ == "__main__":
    key = jax.random.PRNGKey(0)
    N, C, H, W = 2, 4, 16, 16
    feats = jax.random.normal(key, (N, C, H, W), dtype=jnp.float32)

    out = my_psp_module(feats)
    jax.block_until_ready(out)

    ref = my_psp_module_ref(feats)
    assert out.shape == (N, C, 1 + 9 + 36 + 64), out.shape
    np.testing.assert_allclose(np.asarray(out), np.asarray(ref), rtol=1e-5, atol=1e-5)

    print("KERNEL_OK")
</pallas_src>

<mosaic_0001>
module attributes {stable_mosaic.version = 11 : i64} {
  func.func @_psp_matmul_kernel(%arg0: i32, %arg1: memref<8x256xf32, #tpu.memory_space<vmem>>, %arg2: memref<256x128xf32, #tpu.memory_space<vmem>>, %arg3: memref<8x128xf32, #tpu.memory_space<vmem>>) attributes {dimension_semantics = [#tpu.dimension_semantics<parallel>], iteration_bounds = array<i64: 1>, scalar_prefetch = 0 : i64, scratch_operands = 0 : i64, tpu.core_type = #tpu.core_type<tc>, window_params = [{transform_indices = @transform_0, window_bounds = array<i64: 8, 256>}, {pipeline_mode = #tpu.pipeline_mode<synchronous>, transform_indices = @transform_1, window_bounds = array<i64: 256, 128>}, {transform_indices = @transform_2, window_bounds = array<i64: 8, 128>}]} {
    %c0 = arith.constant 0 : index
    %c0_0 = arith.constant 0 : index
    %0 = vector.load %arg1[%c0, %c0_0] : memref<8x256xf32, #tpu.memory_space<vmem>>, vector<8x256xf32>
    %c0_1 = arith.constant 0 : index
    %c0_2 = arith.constant 0 : index
    %1 = vector.load %arg2[%c0_1, %c0_2] : memref<256x128xf32, #tpu.memory_space<vmem>>, vector<256x128xf32>
    %cst = arith.constant dense<0.000000e+00> : vector<8x128xf32>
    %2 = tpu.matmul %0, %1, %cst {dimension_numbers = #tpu.dot_dimension_numbers<[1], [0], [0], [1], [0, 0, 1, 1], [], []>} : vector<8x256xf32>, vector<256x128xf32>, vector<8x128xf32> -> vector<8x128xf32>
    %c0_3 = arith.constant 0 : index
    %c0_4 = arith.constant 0 : index
    %3 = vector.load %arg3[%c0_3, %c0_4] : memref<8x128xf32, #tpu.memory_space<vmem>>, vector<8x128xf32>
    tpu.vector_store %arg3[%c0_3, %c0_4], %2 {strides = array<i32>} : memref<8x128xf32, #tpu.memory_space<vmem>>, vector<8x128xf32>,
    return
  }
  func.func @transform_0(%arg0: i32) -> (i32, i32) {
    %c0_i32 = arith.constant 0 : i32
    %c0_i32_0 = arith.constant 0 : i32
    return %arg0, %c0_i32 : i32, i32
  }
  func.func @transform_1(%arg0: i32) -> (i32, i32) {
    %c0_i32 = arith.constant 0 : i32
    %c0_i32_0 = arith.constant 0 : i32
    %c0_i32_1 = arith.constant 0 : i32
    return %c0_i32, %c0_i32_0 : i32, i32
  }
  func.func @transform_2(%arg0: i32) -> (i32, i32) {
    %c0_i32 = arith.constant 0 : i32
    %c0_i32_0 = arith.constant 0 : i32
    return %arg0, %c0_i32 : i32, i32
  }
}

</mosaic_0001>

<bundles_post_ra>
// kernel: tpu_custom_call.1
= control target key start
LH: loop header
LB: loop body
LE: loop exit
PB: predicated region body
PF: predicated region fallthrough
CT: control target
= control target key end

     0   :  { %7 = vsyncpa [#allocation3], 0  ;;  %s247_s0 = inlined_call_operand.hbm [shape: f32[8,256], index: 0, kind: input, shape index: {}]   ;;  %s248_s1 = inlined_call_operand.hbm [shape: f32[256,128], index: 1, kind: input, shape index: {}]   ;;  %s249_s2 = inlined_call_operand.hbm [shape: f32[8,128], index: 2, kind: output, shape index: {}]  }
   0x1   :  { %8 = vsyncpa [#allocation6], 0 }
   0x2   :  { %9 = vsyncpa [#allocation4], 0  ;;  %s15_s11 = sshll.u32 %s247_s0, 4  ;;  %s218_s12 = smov [#allocation2]   ;;  %s16_s11 = int_to_ptr.hbm [resolvable:$true] %s15_s11 }
   0x3   :  { %s17_s13 = sshll.u32 %s218_s12, 4  ;;  %s25_s16 = sshll.u32 %s248_s1, 4  ;;  %s18_s13 = int_to_ptr.vmem [resolvable:$true] %s17_s13  ;;  %s26_s16 = int_to_ptr.hbm [resolvable:$true] %s25_s16 }
   0x4   :  { %20 = dma.hbm_to_vmem [thread:$0]  %s16_s11, 256, %s18_s13, [#allocation3]  }
   0x5   :  { %s219_s17 = smov [#allocation5]   ;;  %s220_s19 = smov 128  }
   0x6   :  { %s27_s18 = sshll.u32 %s219_s17, 4  ;;  %s221_s20 = smov 8   ;;  %s28_s18 = int_to_ptr.vmem [resolvable:$true] %s27_s18 }
   0x7   :  { %33 = dma.hbm_to_vmem [thread:$0]  %s26_s16, 4096, %s28_s18, [#allocation6], %s220_s19, %s220_s19, %s221_s20  }
   0x8   :  { %212 = dma.done.wait [#allocation3], 256  }
   0x9   :  { %213 = vsyncadd [#allocation3], 4294967040 }
   0xa   :  { %214 = dma.done.wait [#allocation6], 4096  }
   0xb   :  { %215 = vsyncadd [#allocation6], 4294963200  ;;  %v59_v0 = vld [vmem:[#allocation5 + $0x78] sm:$0xff]  ;;  %v58_v2 = vld [vmem:[#allocation5 + $0x70] sm:$0xff]  ;;  %s222_s0 = smov [#allocation7]   ;;  %s124_s23 = sshll.u32 %s249_s2, 4  ;;  %s125_s23 = int_to_ptr.hbm [resolvable:$true] %s124_s23 }
   0xc   :  { %v75_v1 = vld [vmem:[#allocation5 + $0xf8] sm:$0xff]  ;;  %76 = vmatpush.msra.mxu0 %v59_v0  ;;  %v74_v3 = vld [vmem:[#allocation5 + $0xf0] sm:$0xff]  ;;  %v57_v4 = vld [vmem:[#allocation5 + $0x68] sm:$0xff]  ;;  %s122_s1 = sshll.u32 %s222_s0, 4  ;;  %s123_s1 = int_to_ptr.vmem [resolvable:$true] %s122_s1 }
   0xd   :  { %96 = vmatpush.msra.mxu1 %v75_v1  ;;  %v73_v5 = vld [vmem:[#allocation5 + $0xe8] sm:$0xff]  ;;  %v56_v6 = vld [vmem:[#allocation5 + $0x60] sm:$0xff]  ;;  %v55_v8 = vld [vmem:[#allocation5 + $0x58] sm:$0xff] }
   0xe   :  { %77 = vmatpush.msra.mxu0 %v58_v2  ;;  %v72_v7 = vld [vmem:[#allocation5 + $0xe0] sm:$0xff]  ;;  %v71_v9 = vld [vmem:[#allocation5 + $0xd8] sm:$0xff]  ;;  %v54_v10 = vld [vmem:[#allocation5 + $0x50] sm:$0xff] }
   0xf   :  { %97 = vmatpush.msra.mxu1 %v74_v3  ;;  %v70_v11 = vld [vmem:[#allocation5 + $0xd0] sm:$0xff]  ;;  %v53_v12 = vld [vmem:[#allocation5 + $0x48] sm:$0xff]  ;;  %v52_v14 = vld [vmem:[#allocation5 + $0x40] sm:$0xff] }
  0x10   :  { %78 = vmatpush.msra.mxu0 %v57_v4  ;;  %v69_v13 = vld [vmem:[#allocation5 + $0xc8] sm:$0xff]  ;;  %v68_v15 = vld [vmem:[#allocation5 + $0xc0] sm:$0xff]  ;;  %v51_v16 = vld [vmem:[#allocation5 + $0x38] sm:$0xff] }
  0x11   :  { %98 = vmatpush.msra.mxu1 %v73_v5  ;;  %v67_v17 = vld [vmem:[#allocation5 + $0xb8] sm:$0xff]  ;;  %v50_v18 = vld [vmem:[#allocation5 + $0x30] sm:$0xff]  ;;  %v49_v20 = vld [vmem:[#allocation5 + $0x28] sm:$0xff] }
  0x12   :  { %79 = vmatpush.msra.mxu0 %v56_v6  ;;  %v66_v19 = vld [vmem:[#allocation5 + $0xb0] sm:$0xff]  ;;  %v65_v21 = vld [vmem:[#allocation5 + $0xa8] sm:$0xff]  ;;  %v48_v22 = vld [vmem:[#allocation5 + $0x20] sm:$0xff] }
  0x13   :  { %99 = vmatpush.msra.mxu1 %v72_v7  ;;  %v64_v23 = vld [vmem:[#allocation5 + $0xa0] sm:$0xff]  ;;  %v47_v24 = vld [vmem:[#allocation5 + $0x18] sm:$0xff]  ;;  %v46_v26 = vld [vmem:[#allocation5 + $0x10] sm:$0xff] }
  0x14   :  { %80 = vmatpush.msra.mxu0 %v55_v8  ;;  %v63_v25 = vld [vmem:[#allocation5 + $0x98] sm:$0xff]  ;;  %v62_v27 = vld [vmem:[#allocation5 + $0x90] sm:$0xff]  ;;  %v45_v28 = vld [vmem:[#allocation5 + $0x8] sm:$0xff] }
  0x15   :  { %100 = vmatpush.msra.mxu1 %v71_v9  ;;  %v61_v29 = vld [vmem:[#allocation5 + $0x88] sm:$0xff]  ;;  %v44_v30 = vld [vmem:[#allocation5] sm:$0xff]  ;;  %v42_v32 = vld [vmem:[#allocation2] sm:$0xff] }
  0x16   :  { %81 = vmatpush.msra.mxu0 %v54_v10  ;;  %v60_v31 = vld [vmem:[#allocation5 + $0x80] sm:$0xff]  ;;  %v43_v33 = vld [vmem:[#allocation2 + $0x8] sm:$0xff] }
  0x17   :  { %101 = vmatpush.msra.mxu1 %v70_v11 }
  0x18   :  { %82 = vmatpush.msra.mxu0 %v53_v12 }
  0x19   :  { %102 = vmatpush.msra.mxu1 %v69_v13 }
  0x1a   :  { %83 = vmatpush.msra.mxu0 %v52_v14 }
  0x1b   :  { %103 = vmatpush.msra.mxu1 %v68_v15 }
  0x1c   :  { %84 = vmatpush.msra.mxu0 %v51_v16 }
  0x1d   :  { %104 = vmatpush.msra.mxu1 %v67_v17 }
  0x1e   :  { %85 = vmatpush.msra.mxu0 %v50_v18 }
  0x1f   :  { %105 = vmatpush.msra.mxu1 %v66_v19 }
  0x20   :  { %86 = vmatpush.msra.mxu0 %v49_v20 }
  0x21   :  { %106 = vmatpush.msra.mxu1 %v65_v21 }
  0x22   :  { %87 = vmatpush.msra.mxu0 %v48_v22 }
  0x23   :  { %107 = vmatpush.msra.mxu1 %v64_v23 }
  0x24   :  { %88 = vmatpush.msra.mxu0 %v47_v24 }
  0x25   :  { %108 = vmatpush.msra.mxu1 %v63_v25 }
  0x26   :  { %89 = vmatpush.msra.mxu0 %v46_v26 }
  0x27   :  { %109 = vmatpush.msra.mxu1 %v62_v27 }
  0x28   :  { %90 = vmatpush.msra.mxu0 %v45_v28 }
  0x29   :  { %110 = vmatpush.msra.mxu1 %v61_v29 }
  0x2a   :  { %91 = vmatpush.msra.mxu0 %v44_v30 }
  0x2b   :  { %111 = vmatpush.msra.mxu1 %v60_v31  ;;  %92 = vmatmul.f32.vlgmr.msra.gmra.mxu0 %v42_v32 }
  0x2c   :  { %112 = vmatmul.f32.vlgmr.msra.gmra.mxu1 %v43_v33 }
  0xa8   :  { %v93_v34 = vpop.f32.mrf.mxu0 }
  0xa9   :  { %v113_v35 = vpop.f32.mrf.mxu1 }
  0xaa   :  { %v114_v36 = vadd.f32 %v113_v35, %v93_v34 }
  0xac   :  { %116 = vst [vmem:[#allocation7] sm:$0xff] %v114_v36 }
  0xad   :  { %127 = dma.vmem_to_hbm [thread:$0]  %s123_s1, 128, %s125_s23, [#allocation4]  }
  0xae   :  { %216 = dma.done.wait [#allocation4], 128  }
  0xaf   :  { %217 = vsyncadd [#allocation4], 4294967168 }
  0xb0   :  { %132 = vsyncpa [#allocation3], 1 }
  0xb1   :  { %133 = vsyncpa [#allocation6], 1 }
  0xb2   :  { %134 = vsyncpa [#allocation4], 1 }

</bundles_post_ra>
